<compile_context>
chip_gen: v5e
topology: v5e:2x2
jax: 0.10.0
libtpu: 0.0.40
codegen_flags: <defaults>
</compile_context>

<pallas_src>
import jax
import jax.numpy as jnp
from jax.experimental import pallas as pl
from jax.experimental.pallas import tpu as pltpu


def probe_kernel(x_ref, w1_ref, b1_ref, w2_ref, b2_ref, w3_ref, b3_ref,
                 w4t_ref, b4_ref, o_ref):
    """Fused MLP forward for one batch tile: 3x (MXU matmul + bias + relu) + VPU dot + sigmoid."""
    # Layer 1: (TB, D) bf16 @ (D, 256) bf16 -> f32 accumulate.
    h1 = jnp.dot(x_ref[...], w1_ref[...],
                 preferred_element_type=jnp.float32) + b1_ref[...]
    h1 = jnp.maximum(h1, 0.0)

    # Layer 2: downcast activations to bf16 for the MXU, accumulate in f32.
    h2 = jnp.dot(h1.astype(jnp.bfloat16), w2_ref[...],
                 preferred_element_type=jnp.float32) + b2_ref[...]
    h2 = jnp.maximum(h2, 0.0)

    # Layer 3.
    h3 = jnp.dot(h2.astype(jnp.bfloat16), w3_ref[...],
                 preferred_element_type=jnp.float32) + b3_ref[...]
    h3 = jnp.maximum(h3, 0.0)

    # Layer 4 (64 -> 1): broadcast multiply (VPU) + lane reduce (XLU) instead of an N=1 MXU matmul.
    z = jnp.sum(h3 * w4t_ref[...], axis=-1, keepdims=True) + b4_ref[...]

    # Sigmoid: exp and approx reciprocal both land on the EUP slot.
    o_ref[...] = pl.reciprocal(1.0 + jnp.exp(-z), approx=True).astype(o_ref.dtype)


def _round_up(v, m):
    return (v + m - 1) // m * m


def probe_forward(x, params, *, block_b=256):
    """x: (B, D) float32.  params: dict of f32 weights/biases.  Returns (B, 1) float32."""
    B, D = x.shape

    # Batch tile: 256 rows fills the v6e/v7x MXU (and is 2x the v5e MXU rows); for tiny
    # batches fall back to a single sublane-aligned tile to avoid pointless padding.
    tb = block_b if B >= block_b else _round_up(B, 8)
    b_pad = _round_up(B, tb)
    if b_pad != B:
        x = jnp.pad(x, ((0, b_pad - B), (0, 0)))

    # bf16 on the MXU input side; f32 biases; layer-4 weight transposed to a (1, 64) f32 row
    # so the kernel's broadcast-multiply needs no in-kernel transpose.
    x_bf16 = x.astype(jnp.bfloat16)
    w1 = params["w1"].astype(jnp.bfloat16)
    w2 = params["w2"].astype(jnp.bfloat16)
    w3 = params["w3"].astype(jnp.bfloat16)
    w4t = params["w4"].T.astype(jnp.float32)          # (1, 64)
    b1, b2, b3, b4 = params["b1"], params["b2"], params["b3"], params["b4"]

    def resident_spec(shape):
        # Whole-array block, same block index every grid step -> DMA'd once, stays in VMEM.
        return pl.BlockSpec(shape, lambda i: tuple(0 for _ in shape))

    grid = (b_pad // tb,)
    out = pl.pallas_call(
        probe_kernel,
        out_shape=jax.ShapeDtypeStruct((b_pad, 1), jnp.float32),
        grid=grid,
        in_specs=[
            pl.BlockSpec((tb, D), lambda i: (i, 0)),       # x: tiled over batch
            resident_spec(w1.shape), resident_spec(b1.shape),
            resident_spec(w2.shape), resident_spec(b2.shape),
            resident_spec(w3.shape), resident_spec(b3.shape),
            resident_spec(w4t.shape), resident_spec(b4.shape),
        ],
        out_specs=pl.BlockSpec((tb, 1), lambda i: (i, 0)),
        compiler_params=pltpu.CompilerParams(
            dimension_semantics=("parallel",),
            vmem_limit_bytes=48 << 20,
        ),
    )(x_bf16, w1, b1, w2, b2, w3, b3, w4t, b4)

    return out[:B]


def init_params(key, input_size):
    """Deterministic init mimicking nn.Linear's default U(-1/sqrt(fan_in), 1/sqrt(fan_in))."""
    dims = [(input_size, 256), (256, 128), (128, 64), (64, 1)]
    params = {}
    for i, (fan_in, fan_out) in enumerate(dims, start=1):
        key, kw, kb = jax.random.split(key, 3)
        bound = 1.0 / jnp.sqrt(jnp.float32(fan_in))
        params[f"w{i}"] = jax.random.uniform(
            kw, (fan_in, fan_out), jnp.float32, minval=-bound, maxval=bound)
        # biases kept 2-D (1, fan_out) so they broadcast cleanly inside the kernel
        params[f"b{i}"] = jax.random.uniform(
            kb, (1, fan_out), jnp.float32, minval=-bound, maxval=bound)
    return params


def probe_reference(x, params):
    """Plain-JAX f32 reference (PyTorch semantics) for correctness check."""
    h = jnp.maximum(x @ params["w1"] + params["b1"], 0.0)
    h = jnp.maximum(h @ params["w2"] + params["b2"], 0.0)
    h = jnp.maximum(h @ params["w3"] + params["b3"], 0.0)
    return jax.nn.sigmoid(h @ params["w4"] + params["b4"])


if __name__ == "__main__":
    key = jax.random.PRNGKey(0)
    k_params, k_x = jax.random.split(key)

    BATCH = 8
    INPUT_SIZE = 512  # small stand-in for the default 4096 hidden size

    params = init_params(k_params, INPUT_SIZE)
    x = jax.random.normal(k_x, (BATCH, INPUT_SIZE), dtype=jnp.float32)

    out = probe_forward(x, params)
    out = jax.block_until_ready(out)

    ref = probe_reference(x, params)
    assert out.shape == (BATCH, 1)
    # bf16 MXU inputs with f32 accumulation -> loosen tolerance vs the pure-f32 reference.
    assert jnp.allclose(out, ref, atol=2e-2, rtol=2e-2), "mismatch vs reference"

    print("KERNEL_OK")
</pallas_src>

<mosaic_0001>
module attributes {stable_mosaic.version = 11 : i64} {
  func.func @probe_kernel(%arg0: i32, %arg1: memref<8x512xbf16, #tpu.memory_space<vmem>>, %arg2: memref<512x256xbf16, #tpu.memory_space<vmem>>, %arg3: memref<1x256xf32, #tpu.memory_space<vmem>>, %arg4: memref<256x128xbf16, #tpu.memory_space<vmem>>, %arg5: memref<1x128xf32, #tpu.memory_space<vmem>>, %arg6: memref<128x64xbf16, #tpu.memory_space<vmem>>, %arg7: memref<1x64xf32, #tpu.memory_space<vmem>>, %arg8: memref<1x64xf32, #tpu.memory_space<vmem>>, %arg9: memref<1x1xf32, #tpu.memory_space<vmem>>, %arg10: memref<8x1xf32, #tpu.memory_space<vmem>>) attributes {dimension_semantics = [#tpu.dimension_semantics<parallel>], iteration_bounds = array<i64: 1>, scalar_prefetch = 0 : i64, scratch_operands = 0 : i64, tpu.core_type = #tpu.core_type<tc>, window_params = [{transform_indices = @transform_0, window_bounds = array<i64: 8, 512>}, {pipeline_mode = #tpu.pipeline_mode<synchronous>, transform_indices = @transform_1, window_bounds = array<i64: 512, 256>}, {pipeline_mode = #tpu.pipeline_mode<synchronous>, transform_indices = @transform_2, window_bounds = array<i64: 1, 256>}, {pipeline_mode = #tpu.pipeline_mode<synchronous>, transform_indices = @transform_3, window_bounds = array<i64: 256, 128>}, {pipeline_mode = #tpu.pipeline_mode<synchronous>, transform_indices = @transform_4, window_bounds = array<i64: 1, 128>}, {pipeline_mode = #tpu.pipeline_mode<synchronous>, transform_indices = @transform_5, window_bounds = array<i64: 128, 64>}, {pipeline_mode = #tpu.pipeline_mode<synchronous>, transform_indices = @transform_6, window_bounds = array<i64: 1, 64>}, {pipeline_mode = #tpu.pipeline_mode<synchronous>, transform_indices = @transform_7, window_bounds = array<i64: 1, 64>}, {pipeline_mode = #tpu.pipeline_mode<synchronous>, transform_indices = @transform_8, window_bounds = array<i64: 1, 1>}, {transform_indices = @transform_9, window_bounds = array<i64: 8, 1>}]} {
    %c0 = arith.constant 0 : index
    %c0_0 = arith.constant 0 : index
    %0 = vector.load %arg1[%c0, %c0_0] : memref<8x512xbf16, #tpu.memory_space<vmem>>, vector<8x512xbf16>
    %c0_1 = arith.constant 0 : index
    %c0_2 = arith.constant 0 : index
    %1 = vector.load %arg2[%c0_1, %c0_2] : memref<512x256xbf16, #tpu.memory_space<vmem>>, vector<512x256xbf16>
    %cst = arith.constant dense<0.000000e+00> : vector<8x256xf32>
    %2 = tpu.matmul %0, %1, %cst {dimension_numbers = #tpu.dot_dimension_numbers<[1], [0], [0], [1], [0, 0, 1, 1], [], []>} : vector<8x512xbf16>, vector<512x256xbf16>, vector<8x256xf32> -> vector<8x256xf32>
    %c0_3 = arith.constant 0 : index
    %c0_4 = arith.constant 0 : index
    %3 = vector.load %arg3[%c0_3, %c0_4] : memref<1x256xf32, #tpu.memory_space<vmem>>, vector<1x256xf32>
    %4 = vector.broadcast %3 : vector<1x256xf32> to vector<8x256xf32>
    %5 = arith.addf %2, %4 : vector<8x256xf32>
    %cst_5 = arith.constant 0.000000e+00 : f32
    %6 = vector.broadcast %cst_5 : f32 to vector<8x256xf32>
    %7 = arith.maximumf %5, %6 : vector<8x256xf32>
    %8 = arith.truncf %7 : vector<8x256xf32> to vector<8x256xbf16>
    %c0_6 = arith.constant 0 : index
    %c0_7 = arith.constant 0 : index
    %9 = vector.load %arg4[%c0_6, %c0_7] : memref<256x128xbf16, #tpu.memory_space<vmem>>, vector<256x128xbf16>
    %cst_8 = arith.constant dense<0.000000e+00> : vector<8x128xf32>
    %10 = tpu.matmul %8, %9, %cst_8 {dimension_numbers = #tpu.dot_dimension_numbers<[1], [0], [0], [1], [0, 0, 1, 1], [], []>} : vector<8x256xbf16>, vector<256x128xbf16>, vector<8x128xf32> -> vector<8x128xf32>
    %c0_9 = arith.constant 0 : index
    %c0_10 = arith.constant 0 : index
    %11 = vector.load %arg5[%c0_9, %c0_10] : memref<1x128xf32, #tpu.memory_space<vmem>>, vector<1x128xf32>
    %12 = vector.broadcast %11 : vector<1x128xf32> to vector<8x128xf32>
    %13 = arith.addf %10, %12 : vector<8x128xf32>
    %cst_11 = arith.constant 0.000000e+00 : f32
    %14 = vector.broadcast %cst_11 : f32 to vector<8x128xf32>
    %15 = arith.maximumf %13, %14 : vector<8x128xf32>
    %16 = arith.truncf %15 : vector<8x128xf32> to vector<8x128xbf16>
    %c0_12 = arith.constant 0 : index
    %c0_13 = arith.constant 0 : index
    %17 = vector.load %arg6[%c0_12, %c0_13] : memref<128x64xbf16, #tpu.memory_space<vmem>>, vector<128x64xbf16>
    %cst_14 = arith.constant dense<0.000000e+00> : vector<8x64xf32>
    %18 = tpu.matmul %16, %17, %cst_14 {dimension_numbers = #tpu.dot_dimension_numbers<[1], [0], [0], [1], [0, 0, 1, 1], [], []>} : vector<8x128xbf16>, vector<128x64xbf16>, vector<8x64xf32> -> vector<8x64xf32>
    %c0_15 = arith.constant 0 : index
    %c0_16 = arith.constant 0 : index
    %19 = vector.load %arg7[%c0_15, %c0_16] : memref<1x64xf32, #tpu.memory_space<vmem>>, vector<1x64xf32>
    %20 = vector.broadcast %19 : vector<1x64xf32> to vector<8x64xf32>
    %21 = arith.addf %18, %20 : vector<8x64xf32>
    %cst_17 = arith.constant 0.000000e+00 : f32
    %22 = vector.broadcast %cst_17 : f32 to vector<8x64xf32>
    %23 = arith.maximumf %21, %22 : vector<8x64xf32>
    %c0_18 = arith.constant 0 : index
    %c0_19 = arith.constant 0 : index
    %24 = vector.load %arg8[%c0_18, %c0_19] : memref<1x64xf32, #tpu.memory_space<vmem>>, vector<1x64xf32>
    %25 = vector.broadcast %24 : vector<1x64xf32> to vector<8x64xf32>
    %26 = arith.mulf %23, %25 : vector<8x64xf32>
    %cst_20 = arith.constant dense<0.000000e+00> : vector<8xf32>
    %27 = vector.multi_reduction <add>, %26, %cst_20 [1] : vector<8x64xf32> to vector<8xf32>
    %28 = vector.shape_cast %27 : vector<8xf32> to vector<8x1xf32>
    %c0_21 = arith.constant 0 : index
    %c0_22 = arith.constant 0 : index
    %29 = vector.load %arg9[%c0_21, %c0_22] : memref<1x1xf32, #tpu.memory_space<vmem>>, vector<1x1xf32>
    %30 = vector.broadcast %29 : vector<1x1xf32> to vector<8x1xf32>
    %31 = arith.addf %28, %30 : vector<8x1xf32>
    %cst_23 = arith.constant 0.000000e+00 : f32
    %32 = vector.broadcast %cst_23 : f32 to vector<8x1xf32>
    %33 = arith.subf %32, %31 : vector<8x1xf32>
    %34 = math.exp %33 : vector<8x1xf32>
    %cst_24 = arith.constant 1.000000e+00 : f32
    %35 = vector.broadcast %cst_24 : f32 to vector<8x1xf32>
    %36 = arith.addf %35, %34 : vector<8x1xf32>
    %37 = tpu.reciprocal %36 {approx = true} : vector<8x1xf32> -> vector<8x1xf32>
    %c0_25 = arith.constant 0 : index
    %c0_26 = arith.constant 0 : index
    %38 = vector.load %arg10[%c0_25, %c0_26] : memref<8x1xf32, #tpu.memory_space<vmem>>, vector<8x1xf32>
    tpu.vector_store %arg10[%c0_25, %c0_26], %37 {strides = array<i32>} : memref<8x1xf32, #tpu.memory_space<vmem>>, vector<8x1xf32>,
    return
  }
  func.func @transform_0(%arg0: i32) -> (i32, i32) {
    %c0_i32 = arith.constant 0 : i32
    %c0_i32_0 = arith.constant 0 : i32
    return %arg0, %c0_i32 : i32, i32
  }
  func.func @transform_1(%arg0: i32) -> (i32, i32) {
    %c0_i32 = arith.constant 0 : i32
    %c0_i32_0 = arith.constant 0 : i32
    %c0_i32_1 = arith.constant 0 : i32
    return %c0_i32, %c0_i32_0 : i32, i32
  }
  func.func @transform_2(%arg0: i32) -> (i32, i32) {
    %c0_i32 = arith.constant 0 : i32
    %c0_i32_0 = arith.constant 0 : i32
    %c0_i32_1 = arith.constant 0 : i32
    return %c0_i32, %c0_i32_0 : i32, i32
  }
  func.func @transform_3(%arg0: i32) -> (i32, i32) {
    %c0_i32 = arith.constant 0 : i32
    %c0_i32_0 = arith.constant 0 : i32
    %c0_i32_1 = arith.constant 0 : i32
    return %c0_i32, %c0_i32_0 : i32, i32
  }
  func.func @transform_4(%arg0: i32) -> (i32, i32) {
    %c0_i32 = arith.constant 0 : i32
    %c0_i32_0 = arith.constant 0 : i32
    %c0_i32_1 = arith.constant 0 : i32
    return %c0_i32, %c0_i32_0 : i32, i32
  }
  func.func @transform_5(%arg0: i32) -> (i32, i32) {
    %c0_i32 = arith.constant 0 : i32
    %c0_i32_0 = arith.constant 0 : i32
    %c0_i32_1 = arith.constant 0 : i32
    return %c0_i32, %c0_i32_0 : i32, i32
  }
  func.func @transform_6(%arg0: i32) -> (i32, i32) {
    %c0_i32 = arith.constant 0 : i32
    %c0_i32_0 = arith.constant 0 : i32
    %c0_i32_1 = arith.constant 0 : i32
    return %c0_i32, %c0_i32_0 : i32, i32
  }
  func.func @transform_7(%arg0: i32) -> (i32, i32) {
    %c0_i32 = arith.constant 0 : i32
    %c0_i32_0 = arith.constant 0 : i32
    %c0_i32_1 = arith.constant 0 : i32
    return %c0_i32, %c0_i32_0 : i32, i32
  }
  func.func @transform_8(%arg0: i32) -> (i32, i32) {
    %c0_i32 = arith.constant 0 : i32
    %c0_i32_0 = arith.constant 0 : i32
    %c0_i32_1 = arith.constant 0 : i32
    return %c0_i32, %c0_i32_0 : i32, i32
  }
  func.func @transform_9(%arg0: i32) -> (i32, i32) {
    %c0_i32 = arith.constant 0 : i32
    %c0_i32_0 = arith.constant 0 : i32
    return %arg0, %c0_i32 : i32, i32
  }
}

</mosaic_0001>

<bundles_post_ra>
// kernel: tpu_custom_call.1
= control target key start
LH: loop header
LB: loop body
LE: loop exit
PB: predicated region body
PF: predicated region fallthrough
CT: control target
= control target key end

     0   :  { %s1481_s0 = inlined_call_operand.vmem [shape: bf16[8,512], index: 0, kind: input, shape index: {}]   ;;  %s1482_s1 = inlined_call_operand.hbm [shape: bf16[512,256], index: 1, kind: input, shape index: {}]   ;;  %s1483_s2 = inlined_call_operand.vmem [shape: f32[1,256], index: 2, kind: input, shape index: {}]   ;;  %s1484_s3 = inlined_call_operand.hbm [shape: bf16[256,128], index: 3, kind: input, shape index: {}]   ;;  %s1485_s4 = inlined_call_operand.vmem [shape: f32[1,128], index: 4, kind: input, shape index: {}]   ;;  %s1486_s5 = inlined_call_operand.vmem [shape: bf16[128,64], index: 5, kind: input, shape index: {}]   ;;  %s1487_s6 = inlined_call_operand.vmem [shape: f32[1,64], index: 6, kind: input, shape index: {}]   ;;  %s1488_s7 = inlined_call_operand.vmem [shape: f32[1,64], index: 7, kind: input, shape index: {}]   ;;  %s1489_s8 = inlined_call_operand.<no memory space> [shape: f32[1,1], index: 8, kind: input, shape index: {}]   ;;  %s1490_s9 = inlined_call_operand.vmem [shape: f32[8,1], index: 9, kind: output, shape index: {}]  }
   0x1   :  { %v14_v0 = vstv %s1489_s8 }
   0x2   :  { %15 = vst [vmem:[#allocation2] sm:$0x1] %v14_v0 }
   0x3   :  { %16 = vsyncpa [#allocation4], 0  ;;  %s24_s13 = sshll.u32 %s1482_s1, 4  ;;  %s25_s13 = int_to_ptr.hbm [resolvable:$true] %s24_s13 }
   0x4   :  { %17 = vsyncpa [#allocation6], 0  ;;  %s1355_s14 = smov [#allocation3]   ;;  %s39_s18 = sshll.u32 %s1484_s3, 4  ;;  %s40_s18 = int_to_ptr.hbm [resolvable:$true] %s39_s18 }
   0x5   :  { %s26_s15 = sshll.u32 %s1355_s14, 4  ;;  %s1356_s19 = smov 128   ;;  %s27_s15 = int_to_ptr.vmem [resolvable:$true] %s26_s15 }
   0x6   :  { %s1357_s20 = smov 8   ;;  %s1358_s8 = smov [#allocation5]  }
   0x7   :  { %32 = dma.hbm_to_vmem [thread:$0]  %s25_s13, 8192, %s27_s15, [#allocation4], %s1356_s19, %s1356_s19, %s1357_s20  }
   0x8   :  { %s41_s21 = sshll.u32 %s1358_s8, 4  ;;  %s1359_s22 = smov 64   ;;  %s42_s21 = int_to_ptr.vmem [resolvable:$true] %s41_s21 }
   0x9   :  { %s1360_s23 = smov 4  }
   0xa   :  { %47 = dma.hbm_to_vmem [thread:$0]  %s40_s18, 2048, %s42_s21, [#allocation6], %s1359_s22, %s1359_s22, %s1360_s23  }
   0xb   :  { %1351 = dma.done.wait [#allocation4], 8192  }
   0xc   :  { %1352 = vsyncadd [#allocation4], 4294959104 }
   0xd   :  { %1353 = dma.done.wait [#allocation6], 2048  }
   0xe   :  { %1354 = vsyncadd [#allocation6], 4294965248  ;;  %v907_v1 = vld [vmem:[#allocation3 + $0x70] sm:$0xf]  ;;  %v1216_v2 = vld [vmem:[#allocation3 + $0x74] sm:$0xf0] }
   0xf   :  { %v971_v3 = vld [vmem:[#allocation3 + $0xf0] sm:$0xf]  ;;  %v908_v4 = vor.u32 %v1216_v2, %v907_v1  ;;  %v1232_v5 = vld [vmem:[#allocation3 + $0xf4] sm:$0xf0]  ;;  %v899_v12 = vld [vmem:[#allocation3 + $0x60] sm:$0xf] }
  0x10   :  { %v1035_v6 = vld [vmem:[#allocation3 + $0x170] sm:$0xf]  ;;  %v1248_v7 = vld [vmem:[#allocation3 + $0x174] sm:$0xf0]  ;;  %v972_v8 = vor.u32 %v1232_v5, %v971_v3  ;;  %v1214_v14 = vld [vmem:[#allocation3 + $0x64] sm:$0xf0] }
  0x11   :  { %v1036_v9 = vor.u32 %v1248_v7, %v1035_v6  ;;  %v1099_v10 = vld [vmem:[#allocation3 + $0x1f0] sm:$0xf]  ;;  %v1264_v11 = vld [vmem:[#allocation3 + $0x1f4] sm:$0xf0]  ;;  %472 = vmatpush.bf16.msra.mxu0 %v908_v4  ;;  %v963_v15 = vld [vmem:[#allocation3 + $0xe0] sm:$0xf]  ;;  %v900_v17 = vor.u32 %v1214_v14, %v899_v12 }
  0x12   :  { %v1100_v13 = vor.u32 %v1264_v11, %v1099_v10  ;;  %v1230_v16 = vld [vmem:[#allocation3 + $0xe4] sm:$0xf0]  ;;  %485 = vmatpush.bf16.msra.mxu1 %v972_v8  ;;  %v1027_v19 = vld [vmem:[#allocation3 + $0x160] sm:$0xf]  ;;  %v891_v24 = vld [vmem:[#allocation3 + $0x50] sm:$0xf] }
  0x13   :  { %498 = vmatpush.bf16.msra.mxu2 %v1036_v9  ;;  %v964_v18 = vor.u32 %v1230_v16, %v963_v15  ;;  %v1246_v20 = vld [vmem:[#allocation3 + $0x164] sm:$0xf0]  ;;  %v1091_v21 = vld [vmem:[#allocation3 + $0x1e0] sm:$0xf]  ;;  %v1212_v25 = vld [vmem:[#allocation3 + $0x54] sm:$0xf0] }
  0x14   :  { %511 = vmatpush.bf16.msra.mxu3 %v1100_v13  ;;  %v1028_v22 = vor.u32 %v1246_v20, %v1027_v19  ;;  %v1262_v23 = vld [vmem:[#allocation3 + $0x1e4] sm:$0xf0]  ;;  %v955_v27 = vld [vmem:[#allocation3 + $0xd0] sm:$0xf]  ;;  %v1228_v28 = vld [vmem:[#allocation3 + $0xd4] sm:$0xf0]  ;;  %v892_v30 = vor.u32 %v1212_v25, %v891_v24 }
  0x15   :  { %v1092_v26 = vor.u32 %v1262_v23, %v1091_v21  ;;  %v1019_v29 = vld [vmem:[#allocation3 + $0x150] sm:$0xf]  ;;  %473 = vmatpush.bf16.msra.mxu0 %v900_v17  ;;  %v1244_v31 = vld [vmem:[#allocation3 + $0x154] sm:$0xf0]  ;;  %v956_v34 = vor.u32 %v1228_v28, %v955_v27  ;;  %v883_v36 = vld [vmem:[#allocation3 + $0x40] sm:$0xf] }
  0x16   :  { %v1083_v32 = vld [vmem:[#allocation3 + $0x1d0] sm:$0xf]  ;;  %v1260_v33 = vld [vmem:[#allocation3 + $0x1d4] sm:$0xf0]  ;;  %486 = vmatpush.bf16.msra.mxu1 %v964_v18  ;;  %v1020_v35 = vor.u32 %v1244_v31, %v1019_v29  ;;  %v1210_v37 = vld [vmem:[#allocation3 + $0x44] sm:$0xf0] }
  0x17   :  { %499 = vmatpush.bf16.msra.mxu2 %v1028_v22  ;;  %v947_v38 = vld [vmem:[#allocation3 + $0xc0] sm:$0xf]  ;;  %v1084_v39 = vor.u32 %v1260_v33, %v1083_v32  ;;  %v1226_v40 = vld [vmem:[#allocation3 + $0xc4] sm:$0xf0]  ;;  %v884_v45 = vor.u32 %v1210_v37, %v883_v36  ;;  %v875_v48 = vld [vmem:[#allocation3 + $0x30] sm:$0xf] }
  0x18   :  { %512 = vmatpush.bf16.msra.mxu3 %v1092_v26  ;;  %v1011_v41 = vld [vmem:[#allocation3 + $0x140] sm:$0xf]  ;;  %v1242_v42 = vld [vmem:[#allocation3 + $0x144] sm:$0xf0]  ;;  %v948_v46 = vor.u32 %v1226_v40, %v947_v38  ;;  %v1208_v49 = vld [vmem:[#allocation3 + $0x34] sm:$0xf0] }
  0x19   :  { %v1075_v43 = vld [vmem:[#allocation3 + $0x1c0] sm:$0xf]  ;;  %v1258_v44 = vld [vmem:[#allocation3 + $0x1c4] sm:$0xf0]  ;;  %474 = vmatpush.bf16.msra.mxu0 %v892_v30  ;;  %v1012_v47 = vor.u32 %v1242_v42, %v1011_v41  ;;  %v939_v50 = vld [vmem:[#allocation3 + $0xb0] sm:$0xf]  ;;  %v876_v57 = vor.u32 %v1208_v49, %v875_v48 }
  0x1a   :  { %487 = vmatpush.bf16.msra.mxu1 %v956_v34  ;;  %v1076_v51 = vor.u32 %v1258_v44, %v1075_v43  ;;  %v1224_v52 = vld [vmem:[#allocation3 + $0xb4] sm:$0xf0]  ;;  %v1003_v53 = vld [vmem:[#allocation3 + $0x130] sm:$0xf]  ;;  %v867_v60 = vld [vmem:[#allocation3 + $0x20] sm:$0xf] }
  0x1b   :  { %500 = vmatpush.bf16.msra.mxu2 %v1020_v35  ;;  %v1240_v54 = vld [vmem:[#allocation3 + $0x134] sm:$0xf0]  ;;  %v1067_v55 = vld [vmem:[#allocation3 + $0x1b0] sm:$0xf]  ;;  %v940_v58 = vor.u32 %v1224_v52, %v939_v50  ;;  %v1206_v61 = vld [vmem:[#allocation3 + $0x24] sm:$0xf0] }
  0x1c   :  { %513 = vmatpush.bf16.msra.mxu3 %v1084_v39  ;;  %v1256_v56 = vld [vmem:[#allocation3 + $0x1b4] sm:$0xf0]  ;;  %v1004_v59 = vor.u32 %v1240_v54, %v1003_v53  ;;  %v931_v62 = vld [vmem:[#allocation3 + $0xa0] sm:$0xf]  ;;  %v1222_v0 = vld [vmem:[#allocation3 + $0xa4] sm:$0xf0]  ;;  %v868_v5 = vor.u32 %v1206_v61, %v867_v60 }
  0x1d   :  { %475 = vmatpush.bf16.msra.mxu0 %v884_v45  ;;  %v1068_v63 = vor.u32 %v1256_v56, %v1067_v55  ;;  %v995_v1 = vld [vmem:[#allocation3 + $0x120] sm:$0xf]  ;;  %v1238_v2 = vld [vmem:[#allocation3 + $0x124] sm:$0xf0]  ;;  %v932_v6 = vor.u32 %v1222_v0, %v931_v62  ;;  %v859_v8 = vld [vmem:[#allocation3 + $0x10] sm:$0xf] }
  0x1e   :  { %488 = vmatpush.bf16.msra.mxu1 %v948_v46  ;;  %v1059_v3 = vld [vmem:[#allocation3 + $0x1a0] sm:$0xf]  ;;  %v1254_v4 = vld [vmem:[#allocation3 + $0x1a4] sm:$0xf0]  ;;  %v996_v7 = vor.u32 %v1238_v2, %v995_v1  ;;  %v1204_v9 = vld [vmem:[#allocation3 + $0x14] sm:$0xf0] }
  0x1f   :  { %501 = vmatpush.bf16.msra.mxu2 %v1012_v47  ;;  %v923_v10 = vld [vmem:[#allocation3 + $0x90] sm:$0xf]  ;;  %v1060_v11 = vor.u32 %v1254_v4, %v1059_v3  ;;  %v1220_v12 = vld [vmem:[#allocation3 + $0x94] sm:$0xf0]  ;;  %v860_v17 = vor.u32 %v1204_v9, %v859_v8  ;;  %v851_v18 = vld [vmem:[#allocation3] sm:$0xf] }
  0x20   :  { %514 = vmatpush.bf16.msra.mxu3 %v1076_v51  ;;  %v987_v13 = vld [vmem:[#allocation3 + $0x110] sm:$0xf]  ;;  %v1236_v14 = vld [vmem:[#allocation3 + $0x114] sm:$0xf0]  ;;  %v1202_v19 = vld [vmem:[#allocation3 + $0x4] sm:$0xf0]  ;;  %v924_v21 = vor.u32 %v1220_v12, %v923_v10 }
  0x21   :  { %476 = vmatpush.bf16.msra.mxu0 %v876_v57  ;;  %v1051_v15 = vld [vmem:[#allocation3 + $0x190] sm:$0xf]  ;;  %v1252_v16 = vld [vmem:[#allocation3 + $0x194] sm:$0xf0]  ;;  %v915_v20 = vld [vmem:[#allocation3 + $0x80] sm:$0xf]  ;;  %v988_v22 = vor.u32 %v1236_v14, %v987_v13  ;;  %v852_v33 = vor.u32 %v1202_v19, %v851_v18 }
  0x22   :  { %489 = vmatpush.bf16.msra.mxu1 %v940_v58  ;;  %v1218_v23 = vld [vmem:[#allocation3 + $0x84] sm:$0xf0]  ;;  %v979_v24 = vld [vmem:[#allocation3 + $0x100] sm:$0xf]  ;;  %v1052_v26 = vor.u32 %v1252_v16, %v1051_v15  ;;  %v1215_v29 = vld [vmem:[#allocation3 + $0x74] sm:$0xf] }
  0x23   :  { %502 = vmatpush.bf16.msra.mxu2 %v1004_v59  ;;  %v1234_v25 = vld [vmem:[#allocation3 + $0x104] sm:$0xf0]  ;;  %v1043_v27 = vld [vmem:[#allocation3 + $0x180] sm:$0xf]  ;;  %v909_v30 = vld [vmem:[#allocation3 + $0x78] sm:$0xf0]  ;;  %v916_v38 = vor.u32 %v1218_v23, %v915_v20 }
  0x24   :  { %515 = vmatpush.bf16.msra.mxu3 %v1068_v63  ;;  %v1250_v28 = vld [vmem:[#allocation3 + $0x184] sm:$0xf0]  ;;  %v1231_v31 = vld [vmem:[#allocation3 + $0xf4] sm:$0xf]  ;;  %v973_v34 = vld [vmem:[#allocation3 + $0xf8] sm:$0xf0]  ;;  %v980_v39 = vor.u32 %v1234_v25, %v979_v24  ;;  %v912_v44 = vor.u32 %v1215_v29, %v909_v30 }
  0x25   :  { %477 = vmatpush.bf16.msra.mxu0 %v868_v5  ;;  %v67_v32 = vld [vmem:[%s1481_s0 + $0x8] sm:$0xff]  ;;  %v1247_v35 = vld [vmem:[#allocation3 + $0x174] sm:$0xf]  ;;  %v1037_v36 = vld [vmem:[#allocation3 + $0x178] sm:$0xf0]  ;;  %v1044_v43 = vor.u32 %v1250_v28, %v1043_v27  ;;  %v976_v46 = vor.u32 %v1231_v31, %v973_v34  ;;  %vm827_vm0 = vcmask 523264  }
  0x26   :  { %490 = vmatpush.bf16.msra.mxu1 %v932_v6  ;;  %v142_v37 = vunpack.c.l.b16 %v67_v32  ;;  %v1263_v40 = vld [vmem:[#allocation3 + $0x1f4] sm:$0xf]  ;;  %v1101_v41 = vld [vmem:[#allocation3 + $0x1f8] sm:$0xf0]  ;;  %v143_v42 = vunpack.c.h.b16 %v67_v32  ;;  %v1040_v47 = vor.u32 %v1247_v35, %v1037_v36  ;;  %v1213_v48 = vld [vmem:[#allocation3 + $0x64] sm:$0xf] }
  0x27   :  { %503 = vmatpush.bf16.msra.mxu2 %v996_v7  ;;  %v66_v45 = vld [vmem:[%s1481_s0] sm:$0xff]  ;;  %v901_v49 = vld [vmem:[#allocation3 + $0x68] sm:$0xf0]  ;;  %v1104_v53 = vor.u32 %v1263_v40, %v1101_v41  ;;  %v1211_v2 = vld [vmem:[#allocation3 + $0x54] sm:$0xf]  ;;  %vm841_vm1 = vcmask 7168  }
  0x28   :  { %516 = vmatpush.bf16.msra.mxu3 %v1060_v11  ;;  %v1229_v50 = vld [vmem:[#allocation3 + $0xe4] sm:$0xf]  ;;  %v140_v51 = vunpack.c.l.b16 %v66_v45  ;;  %v141_v52 = vunpack.c.h.b16 %v66_v45  ;;  %v965_v54 = vld [vmem:[#allocation3 + $0xe8] sm:$0xf0]  ;;  %v1426_v57 = vpack.c.b16 %v142_v37, %v142_v37  ;;  %v1430_v61 = vpack.c.b16 %v143_v42, %v143_v42  ;;  %v893_v3 = vld [vmem:[#allocation3 + $0x58] sm:$0xf0] }
  0x29   :  { %478 = vmatpush.bf16.msra.mxu0 %v860_v17  ;;  %v1245_v55 = vld [vmem:[#allocation3 + $0x164] sm:$0xf]  ;;  %v1029_v56 = vld [vmem:[#allocation3 + $0x168] sm:$0xf0]  ;;  %v904_v62 = vor.u32 %v1213_v48, %v901_v49  ;;  %v968_v0 = vor.u32 %v1229_v50, %v965_v54  ;;  %v1227_v4 = vld [vmem:[#allocation3 + $0xd4] sm:$0xf]  ;;  %v896_v11 = vor.u32 %v1211_v2, %v893_v3 }
  0x2a   :  { %491 = vmatpush.bf16.msra.mxu1 %v924_v21  ;;  %v1261_v58 = vld [vmem:[#allocation3 + $0x1e4] sm:$0xf]  ;;  %v1093_v59 = vld [vmem:[#allocation3 + $0x1e8] sm:$0xf0]  ;;  %v1428_v60 = vpack.c.b16 %v140_v51, %v140_v51  ;;  %v1432_v63 = vpack.c.b16 %v141_v52, %v141_v52  ;;  %v1032_v1 = vor.u32 %v1245_v55, %v1029_v56  ;;  %v957_v6 = vld [vmem:[#allocation3 + $0xd8] sm:$0xf0] }
  0x2b   :  { %504 = vmatpush.bf16.msra.mxu2 %v988_v22  ;;  %v1096_v5 = vor.u32 %v1261_v58, %v1093_v59  ;;  %v1243_v7 = vld [vmem:[#allocation3 + $0x154] sm:$0xf]  ;;  %v1021_v8 = vld [vmem:[#allocation3 + $0x158] sm:$0xf0]  ;;  %v960_v12 = vor.u32 %v1227_v4, %v957_v6  ;;  %v1209_v14 = vld [vmem:[#allocation3 + $0x44] sm:$0xf] }
  0x2c   :  { %517 = vmatpush.bf16.msra.mxu3 %v1052_v26  ;;  %v1259_v9 = vld [vmem:[#allocation3 + $0x1d4] sm:$0xf]  ;;  %v1085_v10 = vld [vmem:[#allocation3 + $0x1d8] sm:$0xf0]  ;;  %v1024_v13 = vor.u32 %v1243_v7, %v1021_v8  ;;  %v885_v15 = vld [vmem:[#allocation3 + $0x48] sm:$0xf0] }
  0x2d   :  { %479 = vmatpush.bf16.msra.mxu0 %v852_v33  ;;  %v1225_v16 = vld [vmem:[#allocation3 + $0xc4] sm:$0xf]  ;;  %v1088_v17 = vor.u32 %v1259_v9, %v1085_v10  ;;  %v949_v18 = vld [vmem:[#allocation3 + $0xc8] sm:$0xf0]  ;;  %v888_v23 = vor.u32 %v1209_v14, %v885_v15  ;;  %v1207_v26 = vld [vmem:[#allocation3 + $0x34] sm:$0xf] }
  0x2e   :  { %492 = vmatpush.bf16.msra.mxu1 %v916_v38  ;;  %v1241_v19 = vld [vmem:[#allocation3 + $0x144] sm:$0xf]  ;;  %v1013_v20 = vld [vmem:[#allocation3 + $0x148] sm:$0xf0]  ;;  %v952_v24 = vor.u32 %v1225_v16, %v949_v18  ;;  %v877_v27 = vld [vmem:[#allocation3 + $0x38] sm:$0xf0] }
  0x2f   :  { %505 = vmatpush.bf16.msra.mxu2 %v980_v39  ;;  %v1257_v21 = vld [vmem:[#allocation3 + $0x1c4] sm:$0xf]  ;;  %v1077_v22 = vld [vmem:[#allocation3 + $0x1c8] sm:$0xf0]  ;;  %v1016_v25 = vor.u32 %v1241_v19, %v1013_v20  ;;  %v1223_v28 = vld [vmem:[#allocation3 + $0xb4] sm:$0xf]  ;;  %v880_v36 = vor.u32 %v1207_v26, %v877_v27 }
  0x30   :  { %518 = vmatpush.bf16.msra.mxu3 %v1044_v43  ;;  %480 = vmatmul.bf16.vlgmr.msra.gmra.mxu0 %v1428_v60  ;;  %v1080_v29 = vor.u32 %v1257_v21, %v1077_v22  ;;  %v941_v30 = vld [vmem:[#allocation3 + $0xb8] sm:$0xf0]  ;;  %v1239_v31 = vld [vmem:[#allocation3 + $0x134] sm:$0xf]  ;;  %v1205_v35 = vld [vmem:[#allocation3 + $0x24] sm:$0xf] }
  0x31   :  { %524 = vmatpush.bf16.msrb.mxu0 %v912_v44  ;;  %493 = vmatmul.bf16.vlgmr.msra.gmra.mxu1 %v1432_v63  ;;  %v1005_v32 = vld [vmem:[#allocation3 + $0x138] sm:$0xf0]  ;;  %v1255_v33 = vld [vmem:[#allocation3 + $0x1b4] sm:$0xf]  ;;  %v944_v37 = vor.u32 %v1223_v28, %v941_v30  ;;  %v869_v39 = vld [vmem:[#allocation3 + $0x28] sm:$0xf0] }
  0x32   :  { %537 = vmatpush.bf16.msrb.mxu1 %v976_v46  ;;  %506 = vmatmul.bf16.vlgmr.msra.gmra.mxu2 %v1426_v57  ;;  %v1069_v34 = vld [vmem:[#allocation3 + $0x1b8] sm:$0xf0]  ;;  %v1008_v38 = vor.u32 %v1239_v31, %v1005_v32  ;;  %v1221_v40 = vld [vmem:[#allocation3 + $0xa4] sm:$0xf]  ;;  %v933_v42 = vld [vmem:[#allocation3 + $0xa8] sm:$0xf0] }
  0x33   :  { %550 = vmatpush.bf16.msrb.mxu2 %v1040_v47  ;;  %519 = vmatmul.bf16.vlgmr.msra.gmra.mxu3 %v1430_v61  ;;  %v1072_v41 = vor.u32 %v1255_v33, %v1069_v34  ;;  %v1237_v43 = vld [vmem:[#allocation3 + $0x124] sm:$0xf]  ;;  %v997_v44 = vld [vmem:[#allocation3 + $0x128] sm:$0xf0]  ;;  %v872_v47 = vor.u32 %v1205_v35, %v869_v39  ;;  %v936_v48 = vor.u32 %v1221_v40, %v933_v42  ;;  %v1203_v50 = vld [vmem:[#allocation3 + $0x14] sm:$0xf] }
  0x34   :  { %563 = vmatpush.bf16.msrb.mxu3 %v1104_v53  ;;  %v1253_v45 = vld [vmem:[#allocation3 + $0x1a4] sm:$0xf]  ;;  %v1061_v46 = vld [vmem:[#allocation3 + $0x1a8] sm:$0xf0]  ;;  %v1000_v49 = vor.u32 %v1237_v43, %v997_v44  ;;  %v861_v51 = vld [vmem:[#allocation3 + $0x18] sm:$0xf0] }
  0x35   :  { %525 = vmatpush.bf16.msrb.mxu0 %v904_v62  ;;  %v1219_v52 = vld [vmem:[#allocation3 + $0x94] sm:$0xf]  ;;  %v1064_v53 = vor.u32 %v1253_v45, %v1061_v46  ;;  %v925_v54 = vld [vmem:[#allocation3 + $0x98] sm:$0xf0]  ;;  %v864_v62 = vor.u32 %v1203_v50, %v861_v51  ;;  %v1201_v2 = vld [vmem:[#allocation3 + $0x4] sm:$0xf] }
  0x36   :  { %538 = vmatpush.bf16.msrb.mxu1 %v968_v0  ;;  %v1235_v55 = vld [vmem:[#allocation3 + $0x114] sm:$0xf]  ;;  %v989_v56 = vld [vmem:[#allocation3 + $0x118] sm:$0xf0]  ;;  %v928_v0 = vor.u32 %v1219_v52, %v925_v54  ;;  %v853_v3 = vld [vmem:[#allocation3 + $0x8] sm:$0xf0] }
  0x37   :  { %551 = vmatpush.bf16.msrb.mxu2 %v1032_v1  ;;  %v1251_v58 = vld [vmem:[#allocation3 + $0x194] sm:$0xf]  ;;  %v1053_v59 = vld [vmem:[#allocation3 + $0x198] sm:$0xf0]  ;;  %v992_v1 = vor.u32 %v1235_v55, %v989_v56  ;;  %v1217_v4 = vld [vmem:[#allocation3 + $0x84] sm:$0xf] }
  0x38   :  { %564 = vmatpush.bf16.msrb.mxu3 %v1096_v5  ;;  %v1056_v5 = vor.u32 %v1251_v58, %v1053_v59  ;;  %v917_v6 = vld [vmem:[#allocation3 + $0x88] sm:$0xf0]  ;;  %v1233_v7 = vld [vmem:[#allocation3 + $0x104] sm:$0xf]  ;;  %v1272_v15 = vld [vmem:[#allocation5 + $0x38] sm:$0xff] }
  0x39   :  { %526 = vmatpush.bf16.msrb.mxu0 %v896_v11  ;;  %v981_v8 = vld [vmem:[#allocation3 + $0x108] sm:$0xf0]  ;;  %v1249_v9 = vld [vmem:[#allocation3 + $0x184] sm:$0xf]  ;;  %v856_v11 = vor.u32 %v1201_v2, %v853_v3  ;;  %v1271_v16 = vld [vmem:[#allocation5 + $0x30] sm:$0xff] }
  0x3a   :  { %539 = vmatpush.bf16.msrb.mxu1 %v960_v12  ;;  %v1045_v10 = vld [vmem:[#allocation3 + $0x188] sm:$0xf0]  ;;  %v920_v12 = vor.u32 %v1217_v4, %v917_v6  ;;  %v1269_v18 = vld [vmem:[#allocation5 + $0x20] sm:$0xff]  ;;  %v1268_v19 = vld [vmem:[#allocation5 + $0x18] sm:$0xff] }
  0x3b   :  { %552 = vmatpush.bf16.msrb.mxu2 %v1024_v13  ;;  %v984_v13 = vor.u32 %v1233_v7, %v981_v8  ;;  %v1048_v14 = vor.u32 %v1249_v9, %v1045_v10  ;;  %v1267_v20 = vld [vmem:[#allocation5 + $0x10] sm:$0xff]  ;;  %v1266_v21 = vld [vmem:[#allocation5 + $0x8] sm:$0xff]  ;;  %v1280_v22 = vld [vmem:[#allocation5 + $0x78] sm:$0xff] }
  0x3c   :  { %565 = vmatpush.bf16.msrb.mxu3 %v1088_v17  ;;  %v1270_v17 = vld [vmem:[#allocation5 + $0x28] sm:$0xff]  ;;  %v1275_v26 = vld [vmem:[#allocation5 + $0x50] sm:$0xff]  ;;  %v1281_v6 = vld [vmem:[%s1486_s5] sm:$0xff] }
  0x3d   :  { %527 = vmatpush.bf16.msrb.mxu0 %v888_v23  ;;  %v1279_v23 = vld [vmem:[#allocation5 + $0x70] sm:$0xff]  ;;  %v1274_v31 = vld [vmem:[#allocation5 + $0x48] sm:$0xff]  ;;  %v1295_v8 = vld [vmem:[%s1485_s4] ss:$0 sm:$0xff] }
  0x3e   :  { %540 = vmatpush.bf16.msrb.mxu1 %v952_v24  ;;  %v1276_v24 = vld [vmem:[#allocation5 + $0x58] sm:$0xff]  ;;  %v1283_v3 = vld [vmem:[%s1486_s5 + $0x10] sm:$0xff]  ;;  %v1282_v4 = vld [vmem:[%s1486_s5 + $0x8] sm:$0xff] }
  0x3f   :  { %553 = vmatpush.bf16.msrb.mxu2 %v1016_v25  ;;  %v1288_v59 = vld [vmem:[%s1486_s5 + $0x38] sm:$0xff] }
  0x40   :  { %566 = vmatpush.bf16.msrb.mxu3 %v1080_v29  ;;  %v1284_v2 = vld [vmem:[%s1486_s5 + $0x18] sm:$0xff] }
  0x41   :  { %528 = vmatpush.bf16.msrb.mxu0 %v880_v36 }
  0x42   :  { %541 = vmatpush.bf16.msrb.mxu1 %v944_v37  ;;  %v1273_v37 = vld [vmem:[#allocation5 + $0x40] sm:$0xff] }
  0x43   :  { %554 = vmatpush.bf16.msrb.mxu2 %v1008_v38 }
  0x44   :  { %567 = vmatpush.bf16.msrb.mxu3 %v1072_v41 }
  0x45   :  { %529 = vmatpush.bf16.msrb.mxu0 %v872_v47 }
  0x46   :  { %542 = vmatpush.bf16.msrb.mxu1 %v936_v48 }
  0x47   :  { %555 = vmatpush.bf16.msrb.mxu2 %v1000_v49 }
  0x48   :  { %568 = vmatpush.bf16.msrb.mxu3 %v1064_v53 }
  0x49   :  { %530 = vmatpush.bf16.msrb.mxu0 %v864_v62  ;;  %v1287_v62 = vld [vmem:[%s1486_s5 + $0x30] sm:$0xff] }
  0x4a   :  { %543 = vmatpush.bf16.msrb.mxu1 %v928_v0  ;;  %v1286_v0 = vld [vmem:[%s1486_s5 + $0x28] sm:$0xff] }
  0x4b   :  { %556 = vmatpush.bf16.msrb.mxu2 %v992_v1  ;;  %v1285_v1 = vld [vmem:[%s1486_s5 + $0x20] sm:$0xff] }
  0x4c   :  { %569 = vmatpush.bf16.msrb.mxu3 %v1056_v5 }
  0x4d   :  { %531 = vmatpush.bf16.msrb.mxu0 %v856_v11 }
  0x4e   :  { %544 = vmatpush.bf16.msrb.mxu1 %v920_v12 }
  0x4f   :  { %557 = vmatpush.bf16.msrb.mxu2 %v984_v13 }
  0x50   :  { %570 = vmatpush.bf16.msrb.mxu3 %v1048_v14  ;;  %532 = vmatmul.bf16.vlgmr.msrb.gmra.mxu0 %v1428_v60  ;;  %v1265_v60 = vld [vmem:[#allocation5] sm:$0xff] }
  0x51   :  { %712 = vmatpush.bf16.msra.mxu0 %v1272_v15  ;;  %545 = vmatmul.bf16.vlgmr.msrb.gmra.mxu1 %v1432_v63  ;;  %v132_v63 = vld [vmem:[%s1483_s2] sm:$0x3] }
  0x52   :  { %558 = vmatmul.bf16.vlgmr.msrb.gmra.mxu2 %v1426_v57  ;;  %725 = vmatpush.bf16.msra.mxu1 %v1280_v22  ;;  %v1278_v57 = vld [vmem:[#allocation5 + $0x68] sm:$0xff]  ;;  %v134_v25 = vperm.slane %v132_v63, 0  ;;  %v135_v43 = vperm.slane %v132_v63, 1  ;;  %v1296_v15 = vld [vmem:[%s1487_s6] ss:$0 sm:$0xff] }
  0x53   :  { %571 = vmatmul.bf16.vlgmr.msrb.gmra.mxu3 %v1430_v61  ;;  %v1277_v61 = vld [vmem:[#allocation5 + $0x60] sm:$0xff]  ;;  %808 = vmatpush.bf16.msra.mxu2 %v1288_v59 }
  0x55   :  { %713 = vmatpush.bf16.msra.mxu0 %v1271_v16 }
  0x56   :  { %726 = vmatpush.bf16.msra.mxu1 %v1279_v23 }
  0x57   :  { %809 = vmatpush.bf16.msra.mxu2 %v1287_v62 }
  0x59   :  { %714 = vmatpush.bf16.msra.mxu0 %v1270_v17 }
  0x5a   :  { %727 = vmatpush.bf16.msra.mxu1 %v1278_v57 }
  0x5b   :  { %810 = vmatpush.bf16.msra.mxu2 %v1286_v0 }
  0x5d   :  { %715 = vmatpush.bf16.msra.mxu0 %v1269_v18  ;;  %v1297_v18 = vld [vmem:[%s1488_s7] ss:$0 sm:$0xff] }
  0x5e   :  { %728 = vmatpush.bf16.msra.mxu1 %v1277_v61 }
  0x5f   :  { %811 = vmatpush.bf16.msra.mxu2 %v1285_v1 }
  0x61   :  { %716 = vmatpush.bf16.msra.mxu0 %v1268_v19 }
  0x62   :  { %729 = vmatpush.bf16.msra.mxu1 %v1276_v24 }
  0x63   :  { %812 = vmatpush.bf16.msra.mxu2 %v1284_v2 }
  0x65   :  { %717 = vmatpush.bf16.msra.mxu0 %v1267_v20 }
  0x66   :  { %730 = vmatpush.bf16.msra.mxu1 %v1275_v26 }
  0x67   :  { %813 = vmatpush.bf16.msra.mxu2 %v1283_v3 }
  0x69   :  { %718 = vmatpush.bf16.msra.mxu0 %v1266_v21 }
  0x6a   :  { %731 = vmatpush.bf16.msra.mxu1 %v1274_v31 }
  0x6b   :  { %814 = vmatpush.bf16.msra.mxu2 %v1282_v4 }
  0x6d   :  { %719 = vmatpush.bf16.msra.mxu0 %v1265_v60  ;;  %v1298_v60 = vld [vmem:[#allocation2] ss:$0 sm:$0xff] }
  0x6e   :  { %732 = vmatpush.bf16.msra.mxu1 %v1273_v37 }
  0x6f   :  { %815 = vmatpush.bf16.msra.mxu2 %v1281_v6 }
  0xad   :  { %v481_v27 = vpop.f32.mrf.mxu0 }
  0xae   :  { %v482_v28 = vadd.f32 %v481_v27, %v134_v25  ;;  %v494_v29 = vpop.f32.mrf.mxu1 }
  0xb0   :  { %v495_v30 = vadd.f32 %v494_v29, %v482_v28 }
  0xb5   :  { %v507_v32 = vpop.f32.mrf.mxu2  ;;  %v483_v36 = vpop.f32.mrf.mxu0 }
  0xb6   :  { %v508_v33 = vadd.f32 %v507_v32, %v495_v30  ;;  %v520_v34 = vpop.f32.mrf.mxu3  ;;  %v496_v38 = vpop.f32.mrf.mxu1 }
  0xb8   :  { %v521_v35 = vadd.f32 %v520_v34, %v508_v33 }
  0xba   :  { %v576_v39 = vmax.f32 %v521_v35, 0.0 }
  0xbc   :  { %v578_v40 = vpack.c.bf16 %v576_v39, %v576_v39 }
  0xbd   :  { %v509_v41 = vpop.f32.mrf.mxu2 }
  0xbe   :  { %720 = vmatmul.bf16.vlgmr.msra.gmra.mxu0 %v578_v40  ;;  %v522_v42 = vpop.f32.mrf.mxu3 }
  0xcd   :  { %v533_v44 = vpop.f32.mrf.mxu0 }
  0xce   :  { %v534_v45 = vadd.f32 %v533_v44, %v135_v43  ;;  %v546_v46 = vpop.f32.mrf.mxu1 }
  0xd0   :  { %v547_v47 = vadd.f32 %v546_v46, %v534_v45 }
  0xd5   :  { %v559_v48 = vpop.f32.mrf.mxu2  ;;  %v535_v51 = vpop.f32.mrf.mxu0 }
  0xd6   :  { %v560_v49 = vadd.f32 %v559_v48, %v547_v47  ;;  %v572_v50 = vpop.f32.mrf.mxu3  ;;  %v548_v52 = vpop.f32.mrf.mxu1 }
  0xd8   :  { %v573_v53 = vadd.f32 %v572_v50, %v560_v49 }
  0xda   :  { %v577_v54 = vmax.f32 %v573_v53, 0.0 }
  0xdc   :  { %v579_v55 = vpack.c.bf16 %v577_v54, %v577_v54 }
  0xdd   :  { %v561_v56 = vpop.f32.mrf.mxu2 }
  0xde   :  { %v574_v58 = vpop.f32.mrf.mxu3  ;;  %733 = vmatmul.bf16.vlgmr.msra.gmra.mxu1 %v579_v55 }
 0x13b   :  { %v721_v5 = vpop.f32.mrf.mxu0 }
 0x13c   :  { %v722_v9 = vadd.f32 %v1295_v8, %v721_v5 }
 0x143   :  { %v723_v7 = vpop.f32.mrf.mxu0 }
 0x15b   :  { %v734_v10 = vpop.f32.mrf.mxu1 }
 0x15c   :  { %v735_v11 = vadd.f32 %v734_v10, %v722_v9 }
 0x15e   :  { %v738_v12 = vmax.f32 %v735_v11, 0.0 }
 0x160   :  { %v739_v13 = vpack.c.bf16 %v738_v12, %v738_v12 }
 0x162   :  { %816 = vmatmul.bf16.vlgmr.msra.gmra.mxu2 %v739_v13 }
 0x163   :  { %v736_v14 = vpop.f32.mrf.mxu1 }
 0x1e5   :  { %v817_v16 = vpop.f32.mrf.mxu2 }
 0x1e6   :  { %v818_v17 = vadd.f32 %v1296_v15, %v817_v16 }
 0x1e8   :  { %v821_v19 = vmax.f32 %v818_v17, 0.0 }
 0x1ea   :  { %v826_v20 = vmul.f32 %v1297_v18, %v821_v19 }
 0x1ec   :  { %v828_v21 = vsel %vm827_vm0, %v826_v20, 0.0 }
 0x1ed   :  { %v819_v22 = vpop.f32.mrf.mxu2  ;;  %829 = vadd.xlane.f32.xlu0 %v828_v21 }
 0x260   :  { %v830_v23 = vpop.xlane.xlu0 %829 }
 0x261   :  { %v835_v57 = vadd.f32 %v1298_v60, %v830_v23 }
 0x263   :  { %v836_v61 = vsub.f32 0.0, %v835_v57 }
 0x265   :  { %v837_v63 = vmul.f32 1.442695, %v836_v61 }
 0x267   :  { %1299 = vpow2.f32 %v837_v63 }
 0x26d   :  { %v1300_v24 = vpop.eup %1299 }
 0x26e   :  { %v839_v25 = vadd.f32 1.0, %v1300_v24 }
 0x270   :  { %1301 = vrcp.f32 %v839_v25 }
 0x276   :  { %v1302_v26 = vpop.eup %1301 }
 0x277   :  { %842 = vst.msk [vmem:[%s1490_s9] sm:$0xff] %vm841_vm1, %v1302_v26 }
 0x278   :  { %847 = vsyncpa [#allocation4], 1 }
 0x279   :  { %848 = vsyncpa [#allocation6], 1 }

</bundles_post_ra>
